<compile_context>
chip_gen: v5e
topology: v5e:2x2
jax: 0.10.0
libtpu: 0.0.40
codegen_flags: <defaults>
</compile_context>

<pallas_src>
import functools

import numpy as np
import jax
import jax.numpy as jnp
from jax.experimental import pallas as pl
from jax.experimental.pallas import tpu as pltpu


def _round_up(x: int, m: int) -> int:
    return ((x + m - 1) // m) * m


def _build_scatter_weights(num_fields: int, embed_dim: int) -> np.ndarray:
    """0/1 matrix (U*D, U) mapping per-shift products onto row-major triu columns.

    For shift s = j - i the kernel produces prod_s[:, i*D + d] = x[:, i, d] * x[:, j, d]
    (i < F - s). Block s of this matrix sums each D-wide lane group over d and scatters
    it into column k(i, j) — the same order torch.masked_select(triu(ones, 1)) yields.
    """
    F, D = num_fields, embed_dim
    U = F * (F - 1) // 2
    pair_col = {}
    k = 0
    for i in range(F):
        for j in range(i + 1, F):
            pair_col[(i, j)] = k
            k += 1
    w = np.zeros((U * D, U), dtype=np.float32)
    row = 0
    for s in range(1, F):
        for i in range(F - s):
            w[row + i * D: row + (i + 1) * D, pair_col[(i, i + s)]] = 1.0
        row += (F - s) * D
    return w


def _pnn_kernel(x_ref, w_ref, o_ref, *, num_fields: int, embed_dim: int):
    F, D = num_fields, embed_dim
    x = x_ref[...]                                    # (TB, F*D) lane-dense f32
    acc = None
    off = 0
    for s in range(1, F):                             # static: unrolled at trace time
        width = (F - s) * D
        # prod[:, i*D + d] = x[b, i, d] * x[b, i + s, d]   for i in [0, F - s)
        prod = x[:, :width] * x[:, s * D:]            # (TB, (F-s)*D)   VPU
        w_s = w_ref[pl.ds(off, width), :]             # ((F-s)*D, U)    static 0/1 block
        part = jnp.dot(prod, w_s, preferred_element_type=jnp.float32)   # MXU: sum_d + scatter
        acc = part if acc is None else acc + part
        off += width
    o_ref[...] = acc.astype(o_ref.dtype)


def inner_product_interaction(feature_emb, num_fields, *, block_b: int = 2048):
    """Pallas equivalent of InnerProductInteraction.forward.

    feature_emb: (B, F, D) float32
    returns:     (B, F*(F-1)//2) float32 — strict upper triangle of bmm(x, x^T), row-major.
    """
    B, F, D = feature_emb.shape
    assert F == num_fields
    U = F * (F - 1) // 2
    if U == 0:
        return jnp.zeros((B, 0), dtype=jnp.float32)
    FD = F * D

    # Lane-dense 2-D view of the input (contiguous reshape).
    x2d = feature_emb.reshape(B, FD).astype(jnp.float32)

    # Batch tile: large enough to amortize per-step overhead, small enough for all gens.
    tb = min(_round_up(block_b, 8), _round_up(B, 8))
    b_pad = _round_up(B, tb)
    if b_pad != B:
        x2d = jnp.pad(x2d, ((0, b_pad - B), (0, 0)))   # zero rows -> zero outputs, sliced off

    w = jnp.asarray(_build_scatter_weights(F, D))      # (U*D, U); block index is constant
                                                       # across the grid -> stays VMEM-resident

    kernel = functools.partial(_pnn_kernel, num_fields=F, embed_dim=D)
    grid = (b_pad // tb,)

    flops = b_pad * U * D + 2 * b_pad * U * D * U           # VPU multiplies + matmul MACs*2
    bytes_accessed = 4 * (b_pad * FD + U * D * U + b_pad * U)

    out = pl.pallas_call(
        kernel,
        out_shape=jax.ShapeDtypeStruct((b_pad, U), jnp.float32),
        grid_spec=pl.GridSpec(
            grid=grid,
            in_specs=[
                pl.BlockSpec((tb, FD), lambda b: (b, 0)),       # (TB, 128) lane-dense slab
                pl.BlockSpec((U * D, U), lambda b: (0, 0)),     # constant scatter matrix
            ],
            out_specs=pl.BlockSpec((tb, U), lambda b: (b, 0)),  # fused triu output
        ),
        compiler_params=pltpu.CompilerParams(
            dimension_semantics=("parallel",),                  # shard batch tiles across TCs
            vmem_limit_bytes=32 * 1024 * 1024,
        ),
        cost_estimate=pl.CostEstimate(
            flops=flops, transcendentals=0, bytes_accessed=bytes_accessed),
    )(x2d, w)

    return out[:B]


if __name__ == "__main__":
    batch, num_fields, embed_dim = 2, 8, 16

    key = jax.random.PRNGKey(0)
    feature_emb = jax.random.normal(
        key, (batch, num_fields, embed_dim), dtype=jnp.float32)

    out = inner_product_interaction(feature_emb, num_fields)
    out = jax.block_until_ready(out)

    # Pure-JAX reference with exact f32 accumulation (broadcast-multiply-sum).
    ip_ref = jnp.sum(feature_emb[:, :, None, :] * feature_emb[:, None, :, :], axis=-1)
    rows, cols = np.triu_indices(num_fields, k=1)
    ref = ip_ref[:, rows, cols]

    interaction_units = num_fields * (num_fields - 1) // 2
    assert out.shape == (batch, interaction_units)
    assert jnp.allclose(out, ref, atol=1e-3, rtol=1e-3), float(jnp.max(jnp.abs(out - ref)))

    # Also exercise the multi-tile grid + batch-tail-padding path.
    batch2 = 300
    fe2 = jax.random.normal(jax.random.PRNGKey(1),
                            (batch2, num_fields, embed_dim), dtype=jnp.float32)
    out2 = jax.block_until_ready(
        inner_product_interaction(fe2, num_fields, block_b=128))
    ip2 = jnp.sum(fe2[:, :, None, :] * fe2[:, None, :, :], axis=-1)
    ref2 = ip2[:, rows, cols]
    assert out2.shape == (batch2, interaction_units)
    assert jnp.allclose(out2, ref2, atol=1e-3, rtol=1e-3)

    print("KERNEL_OK")
</pallas_src>

<mosaic_0001>
module attributes {stable_mosaic.version = 11 : i64} {
  func.func @_pnn_kernel(%arg0: i32, %arg1: memref<8x128xf32, #tpu.memory_space<vmem>>, %arg2: memref<448x28xf32, #tpu.memory_space<vmem>>, %arg3: memref<8x28xf32, #tpu.memory_space<vmem>>) attributes {dimension_semantics = [#tpu.dimension_semantics<parallel>], iteration_bounds = array<i64: 1>, scalar_prefetch = 0 : i64, scratch_operands = 0 : i64, tpu.core_type = #tpu.core_type<tc>, window_params = [{transform_indices = @transform_0, window_bounds = array<i64: 8, 128>}, {pipeline_mode = #tpu.pipeline_mode<synchronous>, transform_indices = @transform_1, window_bounds = array<i64: 448, 28>}, {transform_indices = @transform_2, window_bounds = array<i64: 8, 28>}]} {
    %c0 = arith.constant 0 : index
    %c0_0 = arith.constant 0 : index
    %0 = vector.load %arg1[%c0, %c0_0] : memref<8x128xf32, #tpu.memory_space<vmem>>, vector<8x128xf32>
    %1 = vector.extract_strided_slice %0 {offsets = [0, 0], sizes = [8, 112], strides = [1, 1]} : vector<8x128xf32> to vector<8x112xf32>
    %2 = vector.extract_strided_slice %0 {offsets = [0, 16], sizes = [8, 112], strides = [1, 1]} : vector<8x128xf32> to vector<8x112xf32>
    %3 = arith.mulf %1, %2 : vector<8x112xf32>
    %c0_1 = arith.constant 0 : index
    %c0_2 = arith.constant 0 : index
    %4 = vector.load %arg2[%c0_1, %c0_2] : memref<448x28xf32, #tpu.memory_space<vmem>>, vector<112x28xf32>
    %cst = arith.constant dense<0.000000e+00> : vector<8x28xf32>
    %5 = tpu.matmul %3, %4, %cst {dimension_numbers = #tpu.dot_dimension_numbers<[1], [0], [0], [1], [0, 0, 1, 1], [], []>} : vector<8x112xf32>, vector<112x28xf32>, vector<8x28xf32> -> vector<8x28xf32>
    %6 = vector.extract_strided_slice %0 {offsets = [0, 0], sizes = [8, 96], strides = [1, 1]} : vector<8x128xf32> to vector<8x96xf32>
    %7 = vector.extract_strided_slice %0 {offsets = [0, 32], sizes = [8, 96], strides = [1, 1]} : vector<8x128xf32> to vector<8x96xf32>
    %8 = arith.mulf %6, %7 : vector<8x96xf32>
    %c112 = arith.constant 112 : index
    %c0_3 = arith.constant 0 : index
    %9 = vector.load %arg2[%c112, %c0_3] : memref<448x28xf32, #tpu.memory_space<vmem>>, vector<96x28xf32>
    %cst_4 = arith.constant dense<0.000000e+00> : vector<8x28xf32>
    %10 = tpu.matmul %8, %9, %cst_4 {dimension_numbers = #tpu.dot_dimension_numbers<[1], [0], [0], [1], [0, 0, 1, 1], [], []>} : vector<8x96xf32>, vector<96x28xf32>, vector<8x28xf32> -> vector<8x28xf32>
    %11 = arith.addf %5, %10 : vector<8x28xf32>
    %12 = vector.extract_strided_slice %0 {offsets = [0, 0], sizes = [8, 80], strides = [1, 1]} : vector<8x128xf32> to vector<8x80xf32>
    %13 = vector.extract_strided_slice %0 {offsets = [0, 48], sizes = [8, 80], strides = [1, 1]} : vector<8x128xf32> to vector<8x80xf32>
    %14 = arith.mulf %12, %13 : vector<8x80xf32>
    %c208 = arith.constant 208 : index
    %c0_5 = arith.constant 0 : index
    %15 = vector.load %arg2[%c208, %c0_5] : memref<448x28xf32, #tpu.memory_space<vmem>>, vector<80x28xf32>
    %cst_6 = arith.constant dense<0.000000e+00> : vector<8x28xf32>
    %16 = tpu.matmul %14, %15, %cst_6 {dimension_numbers = #tpu.dot_dimension_numbers<[1], [0], [0], [1], [0, 0, 1, 1], [], []>} : vector<8x80xf32>, vector<80x28xf32>, vector<8x28xf32> -> vector<8x28xf32>
    %17 = arith.addf %11, %16 : vector<8x28xf32>
    %18 = vector.extract_strided_slice %0 {offsets = [0, 0], sizes = [8, 64], strides = [1, 1]} : vector<8x128xf32> to vector<8x64xf32>
    %19 = vector.extract_strided_slice %0 {offsets = [0, 64], sizes = [8, 64], strides = [1, 1]} : vector<8x128xf32> to vector<8x64xf32>
    %20 = arith.mulf %18, %19 : vector<8x64xf32>
    %c288 = arith.constant 288 : index
    %c0_7 = arith.constant 0 : index
    %21 = vector.load %arg2[%c288, %c0_7] : memref<448x28xf32, #tpu.memory_space<vmem>>, vector<64x28xf32>
    %cst_8 = arith.constant dense<0.000000e+00> : vector<8x28xf32>
    %22 = tpu.matmul %20, %21, %cst_8 {dimension_numbers = #tpu.dot_dimension_numbers<[1], [0], [0], [1], [0, 0, 1, 1], [], []>} : vector<8x64xf32>, vector<64x28xf32>, vector<8x28xf32> -> vector<8x28xf32>
    %23 = arith.addf %17, %22 : vector<8x28xf32>
    %24 = vector.extract_strided_slice %0 {offsets = [0, 0], sizes = [8, 48], strides = [1, 1]} : vector<8x128xf32> to vector<8x48xf32>
    %25 = vector.extract_strided_slice %0 {offsets = [0, 80], sizes = [8, 48], strides = [1, 1]} : vector<8x128xf32> to vector<8x48xf32>
    %26 = arith.mulf %24, %25 : vector<8x48xf32>
    %c352 = arith.constant 352 : index
    %c0_9 = arith.constant 0 : index
    %27 = vector.load %arg2[%c352, %c0_9] : memref<448x28xf32, #tpu.memory_space<vmem>>, vector<48x28xf32>
    %cst_10 = arith.constant dense<0.000000e+00> : vector<8x28xf32>
    %28 = tpu.matmul %26, %27, %cst_10 {dimension_numbers = #tpu.dot_dimension_numbers<[1], [0], [0], [1], [0, 0, 1, 1], [], []>} : vector<8x48xf32>, vector<48x28xf32>, vector<8x28xf32> -> vector<8x28xf32>
    %29 = arith.addf %23, %28 : vector<8x28xf32>
    %30 = vector.extract_strided_slice %0 {offsets = [0, 0], sizes = [8, 32], strides = [1, 1]} : vector<8x128xf32> to vector<8x32xf32>
    %31 = vector.extract_strided_slice %0 {offsets = [0, 96], sizes = [8, 32], strides = [1, 1]} : vector<8x128xf32> to vector<8x32xf32>
    %32 = arith.mulf %30, %31 : vector<8x32xf32>
    %c400 = arith.constant 400 : index
    %c0_11 = arith.constant 0 : index
    %33 = vector.load %arg2[%c400, %c0_11] : memref<448x28xf32, #tpu.memory_space<vmem>>, vector<32x28xf32>
    %cst_12 = arith.constant dense<0.000000e+00> : vector<8x28xf32>
    %34 = tpu.matmul %32, %33, %cst_12 {dimension_numbers = #tpu.dot_dimension_numbers<[1], [0], [0], [1], [0, 0, 1, 1], [], []>} : vector<8x32xf32>, vector<32x28xf32>, vector<8x28xf32> -> vector<8x28xf32>
    %35 = arith.addf %29, %34 : vector<8x28xf32>
    %36 = vector.extract_strided_slice %0 {offsets = [0, 0], sizes = [8, 16], strides = [1, 1]} : vector<8x128xf32> to vector<8x16xf32>
    %37 = vector.extract_strided_slice %0 {offsets = [0, 112], sizes = [8, 16], strides = [1, 1]} : vector<8x128xf32> to vector<8x16xf32>
    %38 = arith.mulf %36, %37 : vector<8x16xf32>
    %c432 = arith.constant 432 : index
    %c0_13 = arith.constant 0 : index
    %39 = vector.load %arg2[%c432, %c0_13] : memref<448x28xf32, #tpu.memory_space<vmem>>, vector<16x28xf32>
    %cst_14 = arith.constant dense<0.000000e+00> : vector<8x28xf32>
    %40 = tpu.matmul %38, %39, %cst_14 {dimension_numbers = #tpu.dot_dimension_numbers<[1], [0], [0], [1], [0, 0, 1, 1], [], []>} : vector<8x16xf32>, vector<16x28xf32>, vector<8x28xf32> -> vector<8x28xf32>
    %41 = arith.addf %35, %40 : vector<8x28xf32>
    %c0_15 = arith.constant 0 : index
    %c0_16 = arith.constant 0 : index
    %42 = vector.load %arg3[%c0_15, %c0_16] : memref<8x28xf32, #tpu.memory_space<vmem>>, vector<8x28xf32>
    tpu.vector_store %arg3[%c0_15, %c0_16], %41 {strides = array<i32>} : memref<8x28xf32, #tpu.memory_space<vmem>>, vector<8x28xf32>,
    return
  }
  func.func @transform_0(%arg0: i32) -> (i32, i32) {
    %c0_i32 = arith.constant 0 : i32
    %c0_i32_0 = arith.constant 0 : i32
    return %arg0, %c0_i32 : i32, i32
  }
  func.func @transform_1(%arg0: i32) -> (i32, i32) {
    %c0_i32 = arith.constant 0 : i32
    %c0_i32_0 = arith.constant 0 : i32
    %c0_i32_1 = arith.constant 0 : i32
    return %c0_i32, %c0_i32_0 : i32, i32
  }
  func.func @transform_2(%arg0: i32) -> (i32, i32) {
    %c0_i32 = arith.constant 0 : i32
    %c0_i32_0 = arith.constant 0 : i32
    return %arg0, %c0_i32 : i32, i32
  }
}

</mosaic_0001>

<bundles_post_ra>
// kernel: tpu_custom_call.1
= control target key start
LH: loop header
LB: loop body
LE: loop exit
PB: predicated region body
PF: predicated region fallthrough
CT: control target
= control target key end

     0   :  { %s330_s13 = smov 112   ;;  %s331_s14 = smov 64   ;;  %s543_s0 = inlined_call_operand.vmem [shape: f32[8,128], index: 0, kind: input, shape index: {}]   ;;  %s544_s1 = inlined_call_operand.vmem [shape: f32[448,28], index: 1, kind: input, shape index: {}]   ;;  %s545_s2 = inlined_call_operand.hbm [shape: f32[8,28], index: 2, kind: output, shape index: {}]  }
   0x1   :  { %v356_v0 = vld [vmem:[%s543_s0] sm:$0xff]  ;;  %v31_v1 = vld [vmem:[%s544_s1 + $0x68] sm:$0xff]  ;;  %v146_v3 = vld [vmem:[%s544_s1 + $0x158] sm:$0xff]  ;;  %s332_s22 = smov 48   ;;  %s333_s15 = smov 96  }
   0x2   :  { %14 = vrot.lane.b32.xlu1 %v356_v0, %s330_s13  ;;  %135 = vrot.lane.b32.xlu0 %v356_v0, %s331_s14  ;;  %v30_v2 = vld [vmem:[%s544_s1 + $0x60] sm:$0xff]  ;;  %v145_v4 = vld [vmem:[%s544_s1 + $0x150] sm:$0xff]  ;;  %s334_s16 = smov 80   ;;  %s335_s24 = smov 32  }
   0x3   :  { %78 = vmatpush.msra.mxu1 %v31_v1  ;;  %159 = vmatpush.msra.mxu3 %v146_v3  ;;  %v47_v5 = vld [vmem:[%s544_s1 + $0xc8] sm:$0xff]  ;;  %v29_v6 = vld [vmem:[%s544_s1 + $0x58] sm:$0xff]  ;;  %v46_v8 = vld [vmem:[%s544_s1 + $0xc0] sm:$0xff] }
   0x4   :  { %172 = vrot.lane.b32.xlu2 %v356_v0, %s332_s22  ;;  %56 = vmatpush.msra.mxu0 %v47_v5  ;;  %v144_v7 = vld [vmem:[%s544_s1 + $0x148] sm:$0xff]  ;;  %v45_v9 = vld [vmem:[%s544_s1 + $0xb8] sm:$0xff]  ;;  %v28_v10 = vld [vmem:[%s544_s1 + $0x50] sm:$0xff] }
   0x5   :  { %79 = vmatpush.msra.mxu1 %v30_v2  ;;  %160 = vmatpush.msra.mxu3 %v145_v4  ;;  %v143_v11 = vld [vmem:[%s544_s1 + $0x140] sm:$0xff]  ;;  %v109_v12 = vld [vmem:[%s544_s1 + $0x118] sm:$0xff]  ;;  %v27_v13 = vld [vmem:[%s544_s1 + $0x48] sm:$0xff] }
   0x6   :  { %57 = vmatpush.msra.mxu0 %v46_v8  ;;  %120 = vmatpush.msra.mxu2 %v109_v12  ;;  %v142_v14 = vld [vmem:[%s544_s1 + $0x138] sm:$0xff]  ;;  %v44_v15 = vld [vmem:[%s544_s1 + $0xb0] sm:$0xff]  ;;  %v26_v16 = vld [vmem:[%s544_s1 + $0x40] sm:$0xff] }
   0x7   :  { %80 = vmatpush.msra.mxu1 %v29_v6  ;;  %161 = vmatpush.msra.mxu3 %v144_v7  ;;  %v108_v17 = vld [vmem:[%s544_s1 + $0x110] sm:$0xff]  ;;  %v43_v19 = vld [vmem:[%s544_s1 + $0xa8] sm:$0xff]  ;;  %v25_v20 = vld [vmem:[%s544_s1 + $0x38] sm:$0xff] }
   0x8   :  { %58 = vmatpush.msra.mxu0 %v45_v9  ;;  %v141_v18 = vld [vmem:[%s544_s1 + $0x130] sm:$0xff]  ;;  %v107_v21 = vld [vmem:[%s544_s1 + $0x108] sm:$0xff] }
   0x9   :  { %81 = vmatpush.msra.mxu1 %v28_v10  ;;  %162 = vmatpush.msra.mxu3 %v143_v11 }
   0xa   :  { %32 = vrot.lane.b32.xlu1 %v356_v0, %s333_s15  ;;  %96 = vrot.lane.b32.xlu0 %v356_v0, %s334_s16 }
   0xb   :  { %82 = vmatpush.msra.mxu1 %v27_v13  ;;  %163 = vmatpush.msra.mxu3 %v142_v14 }
   0xc   :  { %207 = vrot.lane.b32.xlu2 %v356_v0, %s335_s24  ;;  %59 = vmatpush.msra.mxu0 %v44_v15 }
   0xd   :  { %7 = vsyncpa [#allocation3], 0  ;;  %83 = vmatpush.msra.mxu1 %v26_v16  ;;  %121 = vmatpush.msra.mxu2 %v108_v17  ;;  %v140_v22 = vld [vmem:[%s544_s1 + $0x128] sm:$0xff]  ;;  %v42_v23 = vld [vmem:[%s544_s1 + $0xa0] sm:$0xff]  ;;  %s336_s0 = smov 16   ;;  %vm147_vm0 = vcmask 523264  }
   0xe   :  { %164 = vmatpush.msra.mxu3 %v141_v18  ;;  %60 = vmatpush.msra.mxu0 %v43_v19  ;;  %v24_v24 = vld [vmem:[%s544_s1 + $0x30] sm:$0xff]  ;;  %v106_v25 = vld [vmem:[%s544_s1 + $0x100] sm:$0xff]  ;;  %v23_v27 = vld [vmem:[%s544_s1 + $0x28] sm:$0xff]  ;;  %vm72_vm1 = vcmask 916480   ;;  %vm48_vm2 = vcmask 785408   ;;  %vm110_vm3 = vcmask 654336  }
   0xf   :  { %84 = vmatpush.msra.mxu1 %v25_v20  ;;  %122 = vmatpush.msra.mxu2 %v107_v21  ;;  %v139_v26 = vld [vmem:[%s544_s1 + $0x120] sm:$0xff]  ;;  %v41_v28 = vld [vmem:[%s544_s1 + $0x98] sm:$0xff]  ;;  %v181_v30 = vld [vmem:[%s544_s1 + $0x188] sm:$0xff]  ;;  %vm182_vm4 = vcmask 392192   ;;  %vm215_vm5 = vcmask 261120   ;;  %vm246_vm6 = vcmask 130048  }
  0x10   :  { %165 = vmatpush.msra.mxu3 %v140_v22  ;;  %61 = vmatpush.msra.mxu0 %v42_v23  ;;  %v105_v29 = vld [vmem:[%s544_s1 + $0xf8] sm:$0xff]  ;;  %v22_v31 = vld [vmem:[%s544_s1 + $0x20] sm:$0xff]  ;;  %v40_v32 = vld [vmem:[%s544_s1 + $0x90] sm:$0xff]  ;;  %s280_s17 = sshll.u32 %s545_s2, 4  ;;  %vm271_vm7 = vcmask 228352   ;;  %s281_s17 = int_to_ptr.hbm [resolvable:$true] %s280_s17 }
  0x11   :  { %85 = vmatpush.msra.mxu1 %v24_v24  ;;  %123 = vmatpush.msra.mxu2 %v106_v25  ;;  %v21_v33 = vld [vmem:[%s544_s1 + $0x18] sm:$0xff]  ;;  %v104_v34 = vld [vmem:[%s544_s1 + $0xf0] sm:$0xff]  ;;  %v180_v35 = vld [vmem:[%s544_s1 + $0x180] sm:$0xff] }
  0x12   :  { %240 = vrot.lane.b32.xlu0 %v356_v0, %s336_s0  ;;  %166 = vmatpush.msra.mxu3 %v139_v26  ;;  %v39_v36 = vld [vmem:[%s544_s1 + $0x88] sm:$0xff]  ;;  %v20_v37 = vld [vmem:[%s544_s1 + $0x10] sm:$0xff]  ;;  %v179_v39 = vld [vmem:[%s544_s1 + $0x178] sm:$0xff] }
  0x13   :  { %86 = vmatpush.msra.mxu1 %v23_v27  ;;  %62 = vmatpush.msra.mxu0 %v41_v28  ;;  %v103_v38 = vld [vmem:[%s544_s1 + $0xe8] sm:$0xff]  ;;  %v38_v40 = vld [vmem:[%s544_s1 + $0x80] sm:$0xff]  ;;  %v178_v43 = vld [vmem:[%s544_s1 + $0x170] sm:$0xff] }
  0x14   :  { %124 = vmatpush.msra.mxu2 %v105_v29  ;;  %196 = vmatpush.msrb.mxu3 %v181_v30  ;;  %v19_v41 = vld [vmem:[%s544_s1 + $0x8] sm:$0xff]  ;;  %v102_v42 = vld [vmem:[%s544_s1 + $0xe0] sm:$0xff]  ;;  %v37_v44 = vld [vmem:[%s544_s1 + $0x78] sm:$0xff] }
  0x15   :  { %87 = vmatpush.msra.mxu1 %v22_v31  ;;  %63 = vmatpush.msra.mxu0 %v40_v32  ;;  %v18_v45 = vld [vmem:[%s544_s1] sm:$0xff]  ;;  %v101_v46 = vld [vmem:[%s544_s1 + $0xd8] sm:$0xff]  ;;  %v177_v47 = vld [vmem:[%s544_s1 + $0x168] sm:$0xff] }
  0x16   :  { %125 = vmatpush.msra.mxu2 %v104_v34  ;;  %197 = vmatpush.msrb.mxu3 %v180_v35  ;;  %v36_v48 = vld [vmem:[%s544_s1 + $0x70] sm:$0xff]  ;;  %v176_v50 = vld [vmem:[%s544_s1 + $0x160] sm:$0xff]  ;;  %v214_v51 = vld [vmem:[%s544_s1 + $0x1a8] sm:$0xff] }
  0x17   :  { %88 = vmatpush.msra.mxu1 %v21_v33  ;;  %64 = vmatpush.msra.mxu0 %v39_v36  ;;  %v100_v49 = vld [vmem:[%s544_s1 + $0xd0] sm:$0xff]  ;;  %v213_v52 = vld [vmem:[%s544_s1 + $0x1a0] sm:$0xff]  ;;  %v212_v53 = vld [vmem:[%s544_s1 + $0x198] sm:$0xff] }
  0x18   :  { %126 = vmatpush.msra.mxu2 %v103_v38  ;;  %198 = vmatpush.msrb.mxu3 %v179_v39  ;;  %v211_v54 = vld [vmem:[%s544_s1 + $0x190] sm:$0xff]  ;;  %v245_v55 = vld [vmem:[%s544_s1 + $0x1b8] sm:$0xff] }
  0x19   :  { %89 = vmatpush.msra.mxu1 %v20_v37  ;;  %65 = vmatpush.msra.mxu0 %v38_v40  ;;  %v244_v56 = vld [vmem:[%s544_s1 + $0x1b0] sm:$0xff]  ;;  %s337_s1 = smov [#allocation2]  }
  0x1a   :  { %127 = vmatpush.msra.mxu2 %v102_v42  ;;  %199 = vmatpush.msrb.mxu3 %v178_v43  ;;  %s278_s14 = sshll.u32 %s337_s1, 4  ;;  %s279_s14 = int_to_ptr.vmem [resolvable:$true] %s278_s14 }
  0x1b   :  { %90 = vmatpush.msra.mxu1 %v19_v41  ;;  %66 = vmatpush.msra.mxu0 %v37_v44 }
  0x1c   :  { %128 = vmatpush.msra.mxu2 %v101_v46  ;;  %200 = vmatpush.msrb.mxu3 %v177_v47 }
  0x1d   :  { %91 = vmatpush.msra.mxu1 %v18_v45  ;;  %67 = vmatpush.msra.mxu0 %v36_v48 }
  0x1e   :  { %129 = vmatpush.msra.mxu2 %v100_v49  ;;  %201 = vmatpush.msrb.mxu3 %v176_v50 }
  0x1f   :  { %264 = vmatpush.msrb.mxu0 %v245_v55 }
  0x20   :  { %231 = vmatpush.msrb.mxu2 %v214_v51 }
  0x21   :  { %265 = vmatpush.msrb.mxu0 %v244_v56 }
  0x22   :  { %232 = vmatpush.msrb.mxu2 %v213_v52 }
  0x24   :  { %233 = vmatpush.msrb.mxu2 %v212_v53 }
  0x26   :  { %234 = vmatpush.msrb.mxu2 %v211_v54 }
  0x5e   :  { %v173_v61 = vpop.permute.xlu2 %172 }
  0x5f   :  { %v175_v62 = vmul.f32 %v173_v61, %v356_v0 }
  0x66   :  { %v208_v4 = vpop.permute.xlu2 %207 }
  0x67   :  { %v210_v5 = vmul.f32 %v208_v4, %v356_v0 }
  0x74   :  { %v15_v57 = vpop.permute.xlu1 %14  ;;  %v136_v58 = vpop.permute.xlu0 %135 }
  0x75   :  { %v17_v59 = vmul.f32 %v15_v57, %v356_v0  ;;  %v138_v60 = vmul.f32 %v136_v58, %v356_v0 }
  0x77   :  { %292 = vmatmul.msk.f32.vlgmr.msra.gmra.mxu3 %vm147_vm0, %v138_v60  ;;  %290 = vmatmul.msk.f32.vlgmr.msra.gmra.mxu1 %vm72_vm1, %v17_v59 }
  0x7c   :  { %v33_v63 = vpop.permute.xlu1 %32  ;;  %v97_v1 = vpop.permute.xlu0 %96 }
  0x7d   :  { %v35_v2 = vmul.f32 %v33_v63, %v356_v0  ;;  %v99_v3 = vmul.f32 %v97_v1, %v356_v0 }
  0x7f   :  { %289 = vmatmul.msk.f32.vlgmr.msra.gmra.mxu0 %vm48_vm2, %v35_v2  ;;  %291 = vmatmul.msk.f32.vlgmr.msra.gmra.mxu2 %vm110_vm3, %v99_v3 }
  0x80   :  { %293 = vmatmul.msk.f32.vlgmr.msrb.gmra.mxu3 %vm182_vm4, %v175_v62 }
  0x84   :  { %v241_v6 = vpop.permute.xlu0 %240 }
  0x85   :  { %v243_v7 = vmul.f32 %v241_v6, %v356_v0 }
  0x87   :  { %294 = vmatmul.msk.f32.vlgmr.msrb.gmra.mxu2 %vm215_vm5, %v210_v5  ;;  %295 = vmatmul.msk.f32.vlgmr.msrb.gmra.mxu0 %vm246_vm6, %v243_v7 }
  0xf4   :  { %v93_v10 = vpop.f32.mrf.mxu1 }
  0xfa   :  { %v168_v8 = vpop.f32.mrf.mxu3 }
  0xfc   :  { %v69_v9 = vpop.f32.mrf.mxu0 }
  0xfd   :  { %v94_v11 = vadd.f32 %v93_v10, %v69_v9 }
 0x102   :  { %v131_v12 = vpop.f32.mrf.mxu2 }
 0x103   :  { %v134_v13 = vadd.f32 %v131_v12, %v94_v11  ;;  %v203_v15 = vpop.f32.mrf.mxu3 }
 0x104   :  { %v267_v18 = vpop.f32.mrf.mxu0 }
 0x105   :  { %v171_v14 = vadd.f32 %v168_v8, %v134_v13 }
 0x107   :  { %v206_v16 = vadd.f32 %v203_v15, %v171_v14 }
 0x10a   :  { %v236_v17 = vpop.f32.mrf.mxu2 }
 0x10b   :  { %v239_v0 = vadd.f32 %v236_v17, %v206_v16 }
 0x10d   :  { %v270_v19 = vadd.f32 %v267_v18, %v239_v0 }
 0x10f   :  { %272 = vst.msk [vmem:[#allocation2] sm:$0xff] %vm271_vm7, %v270_v19 }
 0x110   :  { %283 = dma.vmem_to_hbm [thread:$0]  %s279_s14, 128, %s281_s17, [#allocation3]  }
 0x111   :  { %328 = dma.done.wait [#allocation3], 128  }
 0x112   :  { %329 = vsyncadd [#allocation3], 4294967168 }
 0x113   :  { %288 = vsyncpa [#allocation3], 1 }

</bundles_post_ra>
